<compile_context>
chip_gen: v6e
topology: v6e:2x2x1
jax: 0.10.0
libtpu: 0.0.40
codegen_flags: <defaults>
</compile_context>

<pallas_src>
import math

import jax
import jax.numpy as jnp
from jax.experimental import pallas as pl
from jax.experimental.pallas import tpu as pltpu

STATE_DIM = 3      # Pendulum-v1 observation: [cos(theta), sin(theta), theta_dot]
N_ACTIONS = 1      # single torque action
H1 = 400
H2 = 300

# Lane/sublane-aligned padded sizes (zero padding is numerically exact:
# padded weight rows/cols are zero and relu(0 + 0) = 0 contributes nothing).
K1_PAD = 8         # layer-1 contraction dim, padded 3 -> 8 sublanes
H1_PAD = 512       # 400 -> 512 (4 x 128 lanes)
H2_PAD = 384       # 300 -> 384 (3 x 128 lanes)
OUT_PAD = 128      # lane-dense MXU tile for layer 3; only column 0 is real


def _round_up(x, m):
    return ((x + m - 1) // m) * m


def actor_kernel(x_ref, w1_ref, b1_ref, w2_ref, b2_ref, w3_ref, b3_ref, o_ref):
    # Layer 1 on the MXU (K padded 3->8, N padded 400->512), f32 weights.
    h1 = jnp.dot(x_ref[...], w1_ref[...],
                 preferred_element_type=jnp.float32) + b1_ref[...]
    h1 = jnp.maximum(h1, 0.0)

    # Layer 2: bf16 MXU matmul, f32 accumulation (N padded 300->384).
    h2 = jnp.dot(h1.astype(jnp.bfloat16), w2_ref[...],
                 preferred_element_type=jnp.float32) + b2_ref[...]
    h2 = jnp.maximum(h2, 0.0)

    # Layer 3: lane-dense (H2_PAD, 128) MXU tile; keep only the real action
    # column before the bias/tanh so the EUP work and HBM writeback are
    # N_ACTIONS wide, not 128 wide.
    a = jnp.dot(h2.astype(jnp.bfloat16), w3_ref[...],
                preferred_element_type=jnp.float32)
    a = a[:, :N_ACTIONS] + b3_ref[...]
    o_ref[...] = (jnp.tanh(a) * 2.0).astype(o_ref.dtype)


def pendulum_actor_forward(state, packed_params, *, tile_b=1024):
    """state: (batch, STATE_DIM) f32 -> (batch, N_ACTIONS) f32."""
    w1, b1, w2, b2, w3, b3 = packed_params
    batch = state.shape[0]

    tile_b = _round_up(tile_b, 8)
    padded8 = _round_up(batch, 8)
    tb = min(tile_b, padded8)
    # Keep at least two grid steps for medium/large batches so v7x's second
    # TensorCore gets work under dimension_semantics=("parallel",).
    if padded8 >= 16 and tb > (padded8 + 1) // 2:
        tb = _round_up((padded8 + 1) // 2, 8)
    padded = _round_up(batch, tb)

    # Zero-pad batch rows to the tile and the feature dim 3 -> K1_PAD.
    state = jnp.pad(state, ((0, padded - batch), (0, K1_PAD - STATE_DIM)))

    grid = (padded // tb,)
    resident = lambda i: (0, 0)   # constant index_map -> stays resident in VMEM

    out = pl.pallas_call(
        actor_kernel,
        out_shape=jax.ShapeDtypeStruct((padded, N_ACTIONS), jnp.float32),
        grid=grid,
        in_specs=[
            pl.BlockSpec((tb, K1_PAD), lambda i: (i, 0)),    # state tile
            pl.BlockSpec((K1_PAD, H1_PAD), resident),        # W1  (f32)
            pl.BlockSpec((1, H1_PAD), resident),             # b1  (f32)
            pl.BlockSpec((H1_PAD, H2_PAD), resident),        # W2  (bf16)
            pl.BlockSpec((1, H2_PAD), resident),             # b2  (f32)
            pl.BlockSpec((H2_PAD, OUT_PAD), resident),       # W3  (bf16)
            pl.BlockSpec((1, N_ACTIONS), resident),          # b3  (f32)
        ],
        out_specs=pl.BlockSpec((tb, N_ACTIONS), lambda i: (i, 0)),
        compiler_params=pltpu.CompilerParams(
            dimension_semantics=("parallel",)),               # shard batch over TCs
    )(state, w1, b1, w2, b2, w3, b3)

    return out[:batch]


def init_params(key):
    """f32 init mirroring torch.nn.Linear default (U[-1/sqrt(fan_in), 1/sqrt(fan_in)]).

    Weights stored as (in_features, out_features) so the kernel computes x @ W.
    """
    keys = jax.random.split(key, 6)

    def linear_init(kw, kb, fan_in, fan_out):
        bound = 1.0 / math.sqrt(fan_in)
        w = jax.random.uniform(kw, (fan_in, fan_out), jnp.float32, -bound, bound)
        b = jax.random.uniform(kb, (1, fan_out), jnp.float32, -bound, bound)
        return w, b

    w1, b1 = linear_init(keys[0], keys[1], STATE_DIM, H1)
    w2, b2 = linear_init(keys[2], keys[3], H1, H2)
    w3, b3 = linear_init(keys[4], keys[5], H2, N_ACTIONS)
    return (w1, b1, w2, b2, w3, b3)


def pack_params(params_f32):
    """Zero-pad to lane/sublane-aligned shapes; quantize W2/W3 to bf16.

    Layer-1 weights stay f32 (tiny + most precision-sensitive).
    """
    w1, b1, w2, b2, w3, b3 = params_f32
    w1p = jnp.zeros((K1_PAD, H1_PAD), jnp.float32).at[:STATE_DIM, :H1].set(w1)
    b1p = jnp.zeros((1, H1_PAD), jnp.float32).at[:, :H1].set(b1)
    w2p = jnp.zeros((H1_PAD, H2_PAD), jnp.float32).at[:H1, :H2].set(w2)
    b2p = jnp.zeros((1, H2_PAD), jnp.float32).at[:, :H2].set(b2)
    w3p = jnp.zeros((H2_PAD, OUT_PAD), jnp.float32).at[:H2, :N_ACTIONS].set(w3)
    b3p = b3.reshape(1, N_ACTIONS)
    return (w1p, b1p,
            w2p.astype(jnp.bfloat16), b2p,
            w3p.astype(jnp.bfloat16), b3p)


def reference_forward(state, packed_params):
    """Pure-JAX oracle replicating the kernel's arithmetic:

    f32 layer 1, bf16-quantized weights *and* activations for layers 2/3 with
    f32 accumulation (matches the kernel up to accumulation order).
    """
    w1p, b1p, w2p, b2p, w3p, b3p = packed_params
    w1 = w1p[:STATE_DIM, :H1]
    b1 = b1p[:, :H1]
    w2 = w2p[:H1, :H2].astype(jnp.float32)
    b2 = b2p[:, :H2]
    w3 = w3p[:H2, :N_ACTIONS].astype(jnp.float32)
    b3 = b3p

    h1 = jnp.maximum(state @ w1 + b1, 0.0)
    h1q = h1.astype(jnp.bfloat16).astype(jnp.float32)
    h2 = jnp.maximum(h1q @ w2 + b2, 0.0)
    h2q = h2.astype(jnp.bfloat16).astype(jnp.float32)
    return jnp.tanh(h2q @ w3 + b3) * 2.0


if __name__ == "__main__":
    key = jax.random.PRNGKey(0)
    pkey, skey1, skey2, skey3 = jax.random.split(key, 4)

    params = pack_params(init_params(pkey))
    fwd = jax.jit(pendulum_actor_forward, static_argnames=("tile_b",))

    # Small per-env-step style batch.
    batch = 2
    state = jax.random.normal(skey1, (batch, STATE_DIM), jnp.float32)
    out = jax.block_until_ready(fwd(state, params))
    ref = reference_forward(state, params)
    assert out.shape == (batch, N_ACTIONS)
    assert jnp.allclose(out, ref, atol=1e-2, rtol=1e-2)

    # Ragged multi-tile batch to exercise the grid + batch-padding path.
    batch2 = 37
    state2 = jax.random.normal(skey2, (batch2, STATE_DIM), jnp.float32)
    out2 = jax.block_until_ready(fwd(state2, params, tile_b=16))
    ref2 = reference_forward(state2, params)
    assert out2.shape == (batch2, N_ACTIONS)
    assert jnp.allclose(out2, ref2, atol=1e-2, rtol=1e-2)

    # Default (large) tile path with the >=2-grid-step cap.
    batch3 = 300
    state3 = jax.random.normal(skey3, (batch3, STATE_DIM), jnp.float32)
    out3 = jax.block_until_ready(fwd(state3, params))
    ref3 = reference_forward(state3, params)
    assert out3.shape == (batch3, N_ACTIONS)
    assert jnp.allclose(out3, ref3, atol=1e-2, rtol=1e-2)

    print("KERNEL_OK")
</pallas_src>

<mosaic_0001>
module attributes {stable_mosaic.version = 11 : i64} {
  func.func @actor_kernel(%arg0: i32, %arg1: memref<8x8xf32, #tpu.memory_space<vmem>>, %arg2: memref<8x512xf32, #tpu.memory_space<vmem>>, %arg3: memref<1x512xf32, #tpu.memory_space<vmem>>, %arg4: memref<512x384xbf16, #tpu.memory_space<vmem>>, %arg5: memref<1x384xf32, #tpu.memory_space<vmem>>, %arg6: memref<384x128xbf16, #tpu.memory_space<vmem>>, %arg7: memref<1x1xf32, #tpu.memory_space<vmem>>, %arg8: memref<8x1xf32, #tpu.memory_space<vmem>>) attributes {dimension_semantics = [#tpu.dimension_semantics<parallel>], iteration_bounds = array<i64: 1>, scalar_prefetch = 0 : i64, scratch_operands = 0 : i64, tpu.core_type = #tpu.core_type<tc>, window_params = [{transform_indices = @transform_0, window_bounds = array<i64: 8, 8>}, {pipeline_mode = #tpu.pipeline_mode<synchronous>, transform_indices = @transform_1, window_bounds = array<i64: 8, 512>}, {pipeline_mode = #tpu.pipeline_mode<synchronous>, transform_indices = @transform_2, window_bounds = array<i64: 1, 512>}, {pipeline_mode = #tpu.pipeline_mode<synchronous>, transform_indices = @transform_3, window_bounds = array<i64: 512, 384>}, {pipeline_mode = #tpu.pipeline_mode<synchronous>, transform_indices = @transform_4, window_bounds = array<i64: 1, 384>}, {pipeline_mode = #tpu.pipeline_mode<synchronous>, transform_indices = @transform_5, window_bounds = array<i64: 384, 128>}, {pipeline_mode = #tpu.pipeline_mode<synchronous>, transform_indices = @transform_6, window_bounds = array<i64: 1, 1>}, {transform_indices = @transform_7, window_bounds = array<i64: 8, 1>}]} {
    %c0 = arith.constant 0 : index
    %c0_0 = arith.constant 0 : index
    %0 = vector.load %arg1[%c0, %c0_0] : memref<8x8xf32, #tpu.memory_space<vmem>>, vector<8x8xf32>
    %c0_1 = arith.constant 0 : index
    %c0_2 = arith.constant 0 : index
    %1 = vector.load %arg2[%c0_1, %c0_2] : memref<8x512xf32, #tpu.memory_space<vmem>>, vector<8x512xf32>
    %cst = arith.constant dense<0.000000e+00> : vector<8x512xf32>
    %2 = tpu.matmul %0, %1, %cst {dimension_numbers = #tpu.dot_dimension_numbers<[1], [0], [0], [1], [0, 0, 1, 1], [], []>} : vector<8x8xf32>, vector<8x512xf32>, vector<8x512xf32> -> vector<8x512xf32>
    %c0_3 = arith.constant 0 : index
    %c0_4 = arith.constant 0 : index
    %3 = vector.load %arg3[%c0_3, %c0_4] : memref<1x512xf32, #tpu.memory_space<vmem>>, vector<1x512xf32>
    %4 = vector.broadcast %3 : vector<1x512xf32> to vector<8x512xf32>
    %5 = arith.addf %2, %4 : vector<8x512xf32>
    %cst_5 = arith.constant 0.000000e+00 : f32
    %6 = vector.broadcast %cst_5 : f32 to vector<8x512xf32>
    %7 = arith.maximumf %5, %6 : vector<8x512xf32>
    %8 = arith.truncf %7 : vector<8x512xf32> to vector<8x512xbf16>
    %c0_6 = arith.constant 0 : index
    %c0_7 = arith.constant 0 : index
    %9 = vector.load %arg4[%c0_6, %c0_7] : memref<512x384xbf16, #tpu.memory_space<vmem>>, vector<512x384xbf16>
    %cst_8 = arith.constant dense<0.000000e+00> : vector<8x384xf32>
    %10 = tpu.matmul %8, %9, %cst_8 {dimension_numbers = #tpu.dot_dimension_numbers<[1], [0], [0], [1], [0, 0, 1, 1], [], []>} : vector<8x512xbf16>, vector<512x384xbf16>, vector<8x384xf32> -> vector<8x384xf32>
    %c0_9 = arith.constant 0 : index
    %c0_10 = arith.constant 0 : index
    %11 = vector.load %arg5[%c0_9, %c0_10] : memref<1x384xf32, #tpu.memory_space<vmem>>, vector<1x384xf32>
    %12 = vector.broadcast %11 : vector<1x384xf32> to vector<8x384xf32>
    %13 = arith.addf %10, %12 : vector<8x384xf32>
    %cst_11 = arith.constant 0.000000e+00 : f32
    %14 = vector.broadcast %cst_11 : f32 to vector<8x384xf32>
    %15 = arith.maximumf %13, %14 : vector<8x384xf32>
    %16 = arith.truncf %15 : vector<8x384xf32> to vector<8x384xbf16>
    %c0_12 = arith.constant 0 : index
    %c0_13 = arith.constant 0 : index
    %17 = vector.load %arg6[%c0_12, %c0_13] : memref<384x128xbf16, #tpu.memory_space<vmem>>, vector<384x128xbf16>
    %cst_14 = arith.constant dense<0.000000e+00> : vector<8x128xf32>
    %18 = tpu.matmul %16, %17, %cst_14 {dimension_numbers = #tpu.dot_dimension_numbers<[1], [0], [0], [1], [0, 0, 1, 1], [], []>} : vector<8x384xbf16>, vector<384x128xbf16>, vector<8x128xf32> -> vector<8x128xf32>
    %19 = vector.extract_strided_slice %18 {offsets = [0, 0], sizes = [8, 1], strides = [1, 1]} : vector<8x128xf32> to vector<8x1xf32>
    %c0_15 = arith.constant 0 : index
    %c0_16 = arith.constant 0 : index
    %20 = vector.load %arg7[%c0_15, %c0_16] : memref<1x1xf32, #tpu.memory_space<vmem>>, vector<1x1xf32>
    %21 = vector.broadcast %20 : vector<1x1xf32> to vector<8x1xf32>
    %22 = arith.addf %19, %21 : vector<8x1xf32>
    %23 = math.tanh %22 : vector<8x1xf32>
    %cst_17 = arith.constant 2.000000e+00 : f32
    %24 = vector.broadcast %cst_17 : f32 to vector<8x1xf32>
    %25 = arith.mulf %23, %24 : vector<8x1xf32>
    %c0_18 = arith.constant 0 : index
    %c0_19 = arith.constant 0 : index
    %26 = vector.load %arg8[%c0_18, %c0_19] : memref<8x1xf32, #tpu.memory_space<vmem>>, vector<8x1xf32>
    tpu.vector_store %arg8[%c0_18, %c0_19], %25 {strides = array<i32>} : memref<8x1xf32, #tpu.memory_space<vmem>>, vector<8x1xf32>,
    return
  }
  func.func @transform_0(%arg0: i32) -> (i32, i32) {
    %c0_i32 = arith.constant 0 : i32
    %c0_i32_0 = arith.constant 0 : i32
    return %arg0, %c0_i32 : i32, i32
  }
  func.func @transform_1(%arg0: i32) -> (i32, i32) {
    %c0_i32 = arith.constant 0 : i32
    %c0_i32_0 = arith.constant 0 : i32
    %c0_i32_1 = arith.constant 0 : i32
    return %c0_i32, %c0_i32_0 : i32, i32
  }
  func.func @transform_2(%arg0: i32) -> (i32, i32) {
    %c0_i32 = arith.constant 0 : i32
    %c0_i32_0 = arith.constant 0 : i32
    %c0_i32_1 = arith.constant 0 : i32
    return %c0_i32, %c0_i32_0 : i32, i32
  }
  func.func @transform_3(%arg0: i32) -> (i32, i32) {
    %c0_i32 = arith.constant 0 : i32
    %c0_i32_0 = arith.constant 0 : i32
    %c0_i32_1 = arith.constant 0 : i32
    return %c0_i32, %c0_i32_0 : i32, i32
  }
  func.func @transform_4(%arg0: i32) -> (i32, i32) {
    %c0_i32 = arith.constant 0 : i32
    %c0_i32_0 = arith.constant 0 : i32
    %c0_i32_1 = arith.constant 0 : i32
    return %c0_i32, %c0_i32_0 : i32, i32
  }
  func.func @transform_5(%arg0: i32) -> (i32, i32) {
    %c0_i32 = arith.constant 0 : i32
    %c0_i32_0 = arith.constant 0 : i32
    %c0_i32_1 = arith.constant 0 : i32
    return %c0_i32, %c0_i32_0 : i32, i32
  }
  func.func @transform_6(%arg0: i32) -> (i32, i32) {
    %c0_i32 = arith.constant 0 : i32
    %c0_i32_0 = arith.constant 0 : i32
    %c0_i32_1 = arith.constant 0 : i32
    return %c0_i32, %c0_i32_0 : i32, i32
  }
  func.func @transform_7(%arg0: i32) -> (i32, i32) {
    %c0_i32 = arith.constant 0 : i32
    %c0_i32_0 = arith.constant 0 : i32
    return %arg0, %c0_i32 : i32, i32
  }
}

</mosaic_0001>

<bundles_post_ra>
// kernel: pendulum_actor_forward.1
= control target key start
LH: loop header
LB: loop body
LE: loop exit
PB: predicated region body
PF: predicated region fallthrough
CT: control target
= control target key end

     0   :  { %s1919_s0 = inlined_call_operand.vmem [shape: f32[8,8], index: 0, kind: input, shape index: {}]   ;;  %s1920_s1 = inlined_call_operand.hbm [shape: f32[8,512], index: 1, kind: input, shape index: {}]   ;;  %s1921_s2 = inlined_call_operand.vmem [shape: f32[1,512], index: 2, kind: input, shape index: {}]   ;;  %s1922_s3 = inlined_call_operand.hbm [shape: bf16[512,384], index: 3, kind: input, shape index: {}]   ;;  %s1923_s4 = inlined_call_operand.vmem [shape: f32[1,384], index: 4, kind: input, shape index: {}]   ;;  %s1924_s5 = inlined_call_operand.hbm [shape: bf16[384,128], index: 5, kind: input, shape index: {}]   ;;  %s1925_s6 = inlined_call_operand.<no memory space> [shape: f32[1,1], index: 6, kind: input, shape index: {}]   ;;  %s1926_s7 = inlined_call_operand.vmem [shape: f32[8,1], index: 7, kind: output, shape index: {}]  }
   0x1   :  { %v12_v0 = vstv %s1925_s6 }
   0x2   :  { %13 = vst [vmem:[#allocation2] sm:$0x1] %v12_v0 }
   0x3   :  { %14 = vsyncpa [#allocation4], 0 }
   0x4   :  { %15 = vsyncpa [#allocation6], 0  ;;  %s1809_s26 = smov [#allocation5]  }
   0x5   :  { %s35_s27 = sshll.u32 %s1809_s26, 4  ;;  %s36_s27 = int_to_ptr.vmem [resolvable:$true] %s35_s27 }
   0x6   :  { %s1753_s28 = scalar_lea.vmem %s36_s27, 12288  ;;  %p1758_p1 = scmp.lt.s32.totalorder %s36_s27, %s36_s27 }
   0x7   :  { %p1754_p0 = scmp.ne.s32.totalorder %s36_s27, %s1753_s28  ;;  %p1759_p2 = scmp.lt.s32.totalorder %s1753_s28, %s1753_s28 }
   0x9   :  { %p1760_p3 = por %p1759_p2, %p1758_p1 }
   0xb   :  { %p1761_p4 = pnand %p1760_p3, %p1754_p0 }
   0xd   :  { %1764 = shalt.err (!%p1761_p4)
}
   0xe   :  { %s1810_s29 = smov 192   ;;  %s1811_s30 = smov 12  }
   0xf   :  { %41 = dma.hbm_to_vmem [thread:$0]  %s1922_s3, 12288, %s36_s27, [#allocation6], %s1810_s29, %s1810_s29, %s1811_s30  }
  0x10   :  { %s1812_s6 = smov [#allocation3]   ;;  %s1813_s11 = smov [#allocation7]  }
  0x11   :  { %s24_s10 = sshll.u32 %s1812_s6, 4  ;;  %s49_s12 = sshll.u32 %s1813_s11, 4  ;;  %s25_s10 = int_to_ptr.vmem [resolvable:$true] %s24_s10  ;;  %s50_s12 = int_to_ptr.vmem [resolvable:$true] %s49_s12 }
  0x12   :  { %s1773_s13 = scalar_lea.vmem %s25_s10, 512  ;;  %p1778_p6 = scmp.lt.s32.totalorder %s25_s10, %s25_s10 }
  0x13   :  { %p1774_p5 = scmp.ne.s32.totalorder %s25_s10, %s1773_s13  ;;  %p1779_p7 = scmp.lt.s32.totalorder %s1773_s13, %s1773_s13 }
  0x15   :  { %p1780_p8 = por %p1779_p7, %p1778_p6 }
  0x17   :  { %p1781_p9 = pnand %p1780_p8, %p1774_p5 }
  0x19   :  { %1784 = shalt.err (!%p1781_p9)
}
  0x1a   :  { %27 = dma.hbm_to_vmem [thread:$0]  %s1920_s1, 512, %s25_s10, [#allocation4]  }
  0x1b   :  { %s1793_s16 = scalar_lea.vmem %s50_s12, 3072  ;;  %p1798_p11 = scmp.lt.s32.totalorder %s50_s12, %s50_s12 }
  0x1c   :  { %p1794_p10 = scmp.ne.s32.totalorder %s50_s12, %s1793_s16  ;;  %p1799_p12 = scmp.lt.s32.totalorder %s1793_s16, %s1793_s16 }
  0x1e   :  { %p1800_p13 = por %p1799_p12, %p1798_p11 }
  0x20   :  { %p1801_p0 = pnand %p1800_p13, %p1794_p10 }
  0x22   :  { %1804 = shalt.err (!%p1801_p0)
}
  0x23   :  { %s1814_s3 = smov 64   ;;  %s1815_s17 = smov 4  }
  0x24   :  { %55 = dma.hbm_to_vmem [thread:$0]  %s1924_s5, 3072, %s50_s12, [#allocation6], %s1814_s3, %s1814_s3, %s1815_s17  }
  0x25   :  { %1805 = dma.done.wait [#allocation4], 512  }
  0x26   :  { %1806 = vsyncadd [#allocation4], 4294966784 }
  0x27   :  { %1807 = dma.done.wait [#allocation6], 15360  }
  0x28   :  { %1808 = vsyncadd [#allocation6], 4294951936  ;;  %v1816_v1 = vmov 0.0   ;;  %v70_v2 = vld [vmem:[#allocation3 + $0x8] sm:$0xff]  ;;  %v72_v3 = vld [vmem:[#allocation3 + $0x18] sm:$0xff]  ;;  %vm95_vm0 = vcmask 64512  }
  0x29   :  { %163 = vmatprep.mubr.f32.mxu0 %v1816_v1  ;;  %234 = vmatprep.mubr.f32.mxu1 %v1816_v1  ;;  %v69_v4 = vld [vmem:[#allocation3] sm:$0xff]  ;;  %v71_v5 = vld [vmem:[#allocation3 + $0x10] sm:$0xff]  ;;  %v1593_v8 = vld [vmem:[#allocation5 + $0xac] ss:$12 sps:$4 sm:$0xff]   ;;  %vm1817_vm1 = vmmov 0   ;;  %vm1356_vm2 = vcmask 7168  }
  0x2a   :  { %129 = vmatprep.subr.mxu0 %v70_v2  ;;  %200 = vmatprep.subr.mxu1 %v72_v3  ;;  %v68_v6 = vld [vmem:[%s1919_s0] sm:$0xff]  ;;  %v1591_v7 = vld [vmem:[#allocation5 + $0xa8] ss:$12 sps:$4 sm:$0xff]   ;;  %v1596_v10 = vld [vmem:[#allocation5 + $0x22c] ss:$12 sps:$4 sm:$0xff]  }
  0x2b   :  { %130 = vmatpush1.msra.mxu0 %v69_v4  ;;  %201 = vmatpush1.msra.mxu1 %v71_v5  ;;  %v1594_v9 = vld [vmem:[#allocation5 + $0x228] ss:$12 sps:$4 sm:$0xff]   ;;  %v1597_v11 = vld [vmem:[#allocation5 + $0x90] ss:$12 sps:$4 sm:$0xff]   ;;  %v1603_v16 = vld [vmem:[#allocation5 + $0x78] ss:$12 sps:$4 sm:$0xff]  }
  0x2c   :  { %1364 = vmatmul.mubr.msk.f32.vlgmr.msra.gmra.mxu0 %vm95_vm0, %v68_v6  ;;  %1365 = vmatmul.mubr.msk.f32.vlgmr.msra.gmra.mxu1 %vm95_vm0, %v68_v6  ;;  %v1599_v12 = vld [vmem:[#allocation5 + $0x94] ss:$12 sps:$4 sm:$0xff]   ;;  %v1600_v14 = vld [vmem:[#allocation5 + $0x210] ss:$12 sps:$4 sm:$0xff]   ;;  %v1606_v19 = vld [vmem:[#allocation5 + $0x1f8] ss:$12 sps:$4 sm:$0xff]  }
  0x2d   :  { %906 = vmatprep.subr.bf16.mxu0 %v1593_v8  ;;  %947 = vmatprep.subr.bf16.mxu1 %v1596_v10  ;;  %v1602_v13 = vld [vmem:[#allocation5 + $0x214] ss:$12 sps:$4 sm:$0xff]   ;;  %v1605_v15 = vld [vmem:[#allocation5 + $0x7c] ss:$12 sps:$4 sm:$0xff]   ;;  %v1611_v18 = vld [vmem:[#allocation5 + $0x64] ss:$12 sps:$4 sm:$0xff]   ;;  %v75_v10 = vlaneseq }
  0x2e   :  { %907 = vmatpush1.bf16.msra.mxu0 %v1591_v7  ;;  %948 = vmatpush1.bf16.msra.mxu1 %v1594_v9  ;;  %v1608_v17 = vld [vmem:[#allocation5 + $0x1fc] ss:$12 sps:$4 sm:$0xff]   ;;  %v1614_v20 = vld [vmem:[#allocation5 + $0x1e4] ss:$12 sps:$4 sm:$0xff]   ;;  %v1609_v21 = vld [vmem:[#allocation5 + $0x60] ss:$12 sps:$4 sm:$0xff]  }
  0x2f   :  { %908 = vmatprep.subr.bf16.mxu0 %v1599_v12  ;;  %949 = vmatprep.subr.bf16.mxu1 %v1602_v13  ;;  %v1617_v22 = vld [vmem:[#allocation5 + $0x4c] ss:$12 sps:$4 sm:$0xff]   ;;  %v1615_v25 = vld [vmem:[#allocation5 + $0x48] ss:$12 sps:$4 sm:$0xff]   ;;  %v1621_v29 = vld [vmem:[#allocation5 + $0x30] ss:$12 sps:$4 sm:$0xff]  }
  0x30   :  { %v1612_v23 = vld [vmem:[#allocation5 + $0x1e0] ss:$12 sps:$4 sm:$0xff]   ;;  %v1618_v27 = vld [vmem:[#allocation5 + $0x1c8] ss:$12 sps:$4 sm:$0xff]   ;;  %v1624_v31 = vld [vmem:[#allocation5 + $0x1b0] ss:$12 sps:$4 sm:$0xff]  }
  0x31   :  { %v1620_v24 = vld [vmem:[#allocation5 + $0x1cc] ss:$12 sps:$4 sm:$0xff]   ;;  %v1623_v26 = vld [vmem:[#allocation5 + $0x34] ss:$12 sps:$4 sm:$0xff]   ;;  %v1629_v30 = vld [vmem:[#allocation5 + $0x1c] ss:$12 sps:$4 sm:$0xff]  }
  0x32   :  { %909 = vmatpush1.bf16.msra.mxu0 %v1597_v11  ;;  %950 = vmatpush1.bf16.msra.mxu1 %v1600_v14  ;;  %v1626_v28 = vld [vmem:[#allocation5 + $0x1b4] ss:$12 sps:$4 sm:$0xff]   ;;  %v1632_v32 = vld [vmem:[#allocation5 + $0x19c] ss:$12 sps:$4 sm:$0xff]   ;;  %v1627_v33 = vld [vmem:[#allocation5 + $0x18] ss:$12 sps:$4 sm:$0xff]  }
  0x33   :  { %910 = vmatprep.subr.bf16.mxu0 %v1605_v15  ;;  %951 = vmatprep.subr.bf16.mxu1 %v1608_v17  ;;  %v1635_v34 = vld [vmem:[#allocation5 + $0x4] ss:$12 sps:$4 sm:$0xff]   ;;  %v1633_v37 = vld [vmem:[#allocation5] ss:$12 sps:$4 sm:$0xff]   ;;  %v1639_v41 = vld [vmem:[#allocation5 + $0x168] ss:$12 sps:$4 sm:$0xff]  }
  0x34   :  { %v1630_v35 = vld [vmem:[#allocation5 + $0x198] ss:$12 sps:$4 sm:$0xff]   ;;  %v1636_v39 = vld [vmem:[#allocation5 + $0x180] ss:$12 sps:$4 sm:$0xff]   ;;  %v1642_v43 = vld [vmem:[#allocation5 + $0x2e8] ss:$12 sps:$4 sm:$0xff]  }
  0x35   :  { %v1638_v36 = vld [vmem:[#allocation5 + $0x184] ss:$12 sps:$4 sm:$0xff]   ;;  %v1641_v38 = vld [vmem:[#allocation5 + $0x16c] ss:$12 sps:$4 sm:$0xff]   ;;  %v1647_v42 = vld [vmem:[#allocation5 + $0x154] ss:$12 sps:$4 sm:$0xff]  }
  0x36   :  { %911 = vmatpush1.bf16.msra.mxu0 %v1603_v16  ;;  %952 = vmatpush1.bf16.msra.mxu1 %v1606_v19  ;;  %v1644_v40 = vld [vmem:[#allocation5 + $0x2ec] ss:$12 sps:$4 sm:$0xff]   ;;  %v1650_v44 = vld [vmem:[#allocation5 + $0x2d4] ss:$12 sps:$4 sm:$0xff]   ;;  %v1645_v45 = vld [vmem:[#allocation5 + $0x150] ss:$12 sps:$4 sm:$0xff]  }
  0x37   :  { %912 = vmatprep.subr.bf16.mxu0 %v1611_v18  ;;  %953 = vmatprep.subr.bf16.mxu1 %v1614_v20  ;;  %v1648_v46 = vld [vmem:[#allocation5 + $0x2d0] ss:$12 sps:$4 sm:$0xff]   ;;  %v1651_v48 = vld [vmem:[#allocation5 + $0x138] ss:$12 sps:$4 sm:$0xff]   ;;  %v1657_v53 = vld [vmem:[#allocation5 + $0x120] ss:$12 sps:$4 sm:$0xff]  }
  0x38   :  { %v1653_v47 = vld [vmem:[#allocation5 + $0x13c] ss:$12 sps:$4 sm:$0xff]   ;;  %v1659_v50 = vld [vmem:[#allocation5 + $0x124] ss:$12 sps:$4 sm:$0xff]   ;;  %v1665_v54 = vld [vmem:[#allocation5 + $0x10c] ss:$12 sps:$4 sm:$0xff]  }
  0x39   :  { %v1656_v49 = vld [vmem:[#allocation5 + $0x2bc] ss:$12 sps:$4 sm:$0xff]   ;;  %v1654_v51 = vld [vmem:[#allocation5 + $0x2b8] ss:$12 sps:$4 sm:$0xff]   ;;  %v1660_v55 = vld [vmem:[#allocation5 + $0x2a0] ss:$12 sps:$4 sm:$0xff]  }
  0x3a   :  { %913 = vmatpush1.bf16.msra.mxu0 %v1609_v21  ;;  %954 = vmatpush1.bf16.msra.mxu1 %v1612_v23  ;;  %v1662_v52 = vld [vmem:[#allocation5 + $0x2a4] ss:$12 sps:$4 sm:$0xff]   ;;  %v1668_v56 = vld [vmem:[#allocation5 + $0x28c] ss:$12 sps:$4 sm:$0xff]   ;;  %v1663_v57 = vld [vmem:[#allocation5 + $0x108] ss:$12 sps:$4 sm:$0xff]  }
  0x3b   :  { %914 = vmatprep.subr.bf16.mxu0 %v1617_v22  ;;  %955 = vmatprep.subr.bf16.mxu1 %v1620_v24  ;;  %v1671_v58 = vld [vmem:[#allocation5 + $0xf4] ss:$12 sps:$4 sm:$0xff]   ;;  %v1669_v61 = vld [vmem:[#allocation5 + $0xf0] ss:$12 sps:$4 sm:$0xff]   ;;  %v1675_v2 = vld [vmem:[#allocation5 + $0xd8] ss:$12 sps:$4 sm:$0xff]  }
  0x3c   :  { %v1666_v59 = vld [vmem:[#allocation5 + $0x288] ss:$12 sps:$4 sm:$0xff]   ;;  %v1672_v62 = vld [vmem:[#allocation5 + $0x270] ss:$12 sps:$4 sm:$0xff]   ;;  %v1678_v3 = vld [vmem:[#allocation5 + $0x258] ss:$12 sps:$4 sm:$0xff]  }
  0x3d   :  { %v1674_v60 = vld [vmem:[#allocation5 + $0x274] ss:$12 sps:$4 sm:$0xff]   ;;  %v1677_v63 = vld [vmem:[#allocation5 + $0xdc] ss:$12 sps:$4 sm:$0xff]   ;;  %v1683_v4 = vld [vmem:[#allocation5 + $0xc4] ss:$12 sps:$4 sm:$0xff]  }
  0x3e   :  { %915 = vmatpush1.bf16.msra.mxu0 %v1615_v25  ;;  %956 = vmatpush1.bf16.msra.mxu1 %v1618_v27  ;;  %v1680_v0 = vld [vmem:[#allocation5 + $0x25c] ss:$12 sps:$4 sm:$0xff]   ;;  %v1686_v5 = vld [vmem:[#allocation5 + $0x244] ss:$12 sps:$4 sm:$0xff]   ;;  %v1681_v6 = vld [vmem:[#allocation5 + $0xc0] ss:$12 sps:$4 sm:$0xff]  }
  0x3f   :  { %916 = vmatprep.subr.bf16.mxu0 %v1623_v26  ;;  %957 = vmatprep.subr.bf16.mxu1 %v1626_v28  ;;  %v1684_v7 = vld [vmem:[#allocation5 + $0x240] ss:$12 sps:$4 sm:$0xff]   ;;  %v1687_v8 = vld [vmem:[#allocation5 + $0x170] ss:$12 sps:$4 sm:$0xff]   ;;  %v1875_v11 = vshrl.u32 %v75_v10, 7 }
  0x40   :  { %v1688_v9 = vld [vmem:[#allocation5 + $0x2f0] ss:$12 sps:$4 sm:$0xff]   ;;  %v1725_v10 = vld [vmem:[#allocation7 + $0x60] sm:$0xff]  }
  0x41   :  { %v77_v12 = vsub.s32 0, %v1875_v11  ;;  %v85_v13 = vsub.s32 2, %v1875_v11  ;;  %v73_v14 = vld [vmem:[%s1921_s2] sm:$0xf]  ;;  %v81_v15 = vsub.s32 1, %v1875_v11  ;;  %v89_v16 = vsub.s32 3, %v1875_v11 }
  0x42   :  { %917 = vmatpush1.bf16.msra.mxu0 %v1621_v29  ;;  %958 = vmatpush1.bf16.msra.mxu1 %v1624_v31 }
  0x43   :  { %918 = vmatprep.subr.bf16.mxu0 %v1629_v30  ;;  %959 = vmatprep.subr.bf16.mxu1 %v1632_v32  ;;  %v78_v17 = vrot.slane %v73_v14, %v77_v12  ;;  %v86_v18 = vrot.slane %v73_v14, %v85_v13  ;;  %v82_v19 = vrot.slane %v73_v14, %v81_v15 }
  0x44   :  { %v90_v20 = vrot.slane %v73_v14, %v89_v16  ;;  %v1726_v14 = vld [vmem:[#allocation7 + $0x20] sm:$0xff]   ;;  %v1727_v16 = vld [vmem:[#allocation7 + $0x58] sm:$0xff]  }
  0x46   :  { %919 = vmatpush1.bf16.msra.mxu0 %v1627_v33  ;;  %960 = vmatpush1.bf16.msra.mxu1 %v1630_v35 }
  0x47   :  { %920 = vmatprep.subr.bf16.mxu0 %v1635_v34  ;;  %961 = vmatprep.subr.bf16.mxu1 %v1638_v36  ;;  %v1689_v36 = vld [vmem:[#allocation5 + $0xb0] ss:$12 sps:$4 sm:$0xff]  }
  0x4a   :  { %921 = vmatpush1.bf16.msra.mxu0 %v1633_v37  ;;  %962 = vmatpush1.bf16.msra.mxu1 %v1636_v39  ;;  %v1690_v37 = vld [vmem:[#allocation5 + $0x230] ss:$12 sps:$4 sm:$0xff]   ;;  %v1691_v39 = vld [vmem:[#allocation5 + $0x158] ss:$12 sps:$4 sm:$0xff]  }
  0x4b   :  { %922 = vmatprep.subr.bf16.mxu0 %v1641_v38  ;;  %963 = vmatprep.subr.bf16.mxu1 %v1644_v40  ;;  %v1692_v40 = vld [vmem:[#allocation5 + $0x2d8] ss:$12 sps:$4 sm:$0xff]  }
  0x4e   :  { %923 = vmatpush2.bf16.msra.mxu0 %v1639_v41  ;;  %964 = vmatpush2.bf16.msra.mxu1 %v1642_v43  ;;  %v1693_v41 = vld [vmem:[#allocation5 + $0x98] ss:$12 sps:$4 sm:$0xff]   ;;  %v1695_v43 = vld [vmem:[#allocation5 + $0x140] ss:$12 sps:$4 sm:$0xff]  }
  0x4f   :  { %924 = vmatprep.subr.bf16.mxu0 %v1647_v42  ;;  %965 = vmatprep.subr.bf16.mxu1 %v1650_v44  ;;  %v1694_v42 = vld [vmem:[#allocation5 + $0x218] ss:$12 sps:$4 sm:$0xff]   ;;  %v1696_v44 = vld [vmem:[#allocation5 + $0x2c0] ss:$12 sps:$4 sm:$0xff]  }
  0x52   :  { %925 = vmatpush2.bf16.msra.mxu0 %v1645_v45  ;;  %966 = vmatpush2.bf16.msra.mxu1 %v1648_v46  ;;  %v1697_v45 = vld [vmem:[#allocation5 + $0x80] ss:$12 sps:$4 sm:$0xff]  }
  0x53   :  { %926 = vmatprep.subr.bf16.mxu0 %v1653_v47  ;;  %967 = vmatprep.subr.bf16.mxu1 %v1656_v49  ;;  %v1698_v46 = vld [vmem:[#allocation5 + $0x200] ss:$12 sps:$4 sm:$0xff]   ;;  %v1699_v47 = vld [vmem:[#allocation5 + $0x128] ss:$12 sps:$4 sm:$0xff]  }
  0x54   :  { %v1701_v49 = vld [vmem:[#allocation5 + $0x68] ss:$12 sps:$4 sm:$0xff]  }
  0x56   :  { %927 = vmatpush2.bf16.msra.mxu0 %v1651_v48  ;;  %968 = vmatpush2.bf16.msra.mxu1 %v1654_v51  ;;  %v1700_v48 = vld [vmem:[#allocation5 + $0x2a8] ss:$12 sps:$4 sm:$0xff]   ;;  %v1703_v51 = vld [vmem:[#allocation5 + $0x110] ss:$12 sps:$4 sm:$0xff]  }
  0x57   :  { %928 = vmatprep.subr.bf16.mxu0 %v1659_v50  ;;  %969 = vmatprep.subr.bf16.mxu1 %v1662_v52  ;;  %v1702_v50 = vld [vmem:[#allocation5 + $0x1e8] ss:$12 sps:$4 sm:$0xff]   ;;  %v1704_v52 = vld [vmem:[#allocation5 + $0x290] ss:$12 sps:$4 sm:$0xff]  }
  0x5a   :  { %929 = vmatpush2.bf16.msra.mxu0 %v1657_v53  ;;  %970 = vmatpush2.bf16.msra.mxu1 %v1660_v55  ;;  %v1705_v53 = vld [vmem:[#allocation5 + $0x50] ss:$12 sps:$4 sm:$0xff]   ;;  %v1707_v55 = vld [vmem:[#allocation5 + $0xf8] ss:$12 sps:$4 sm:$0xff]  }
  0x5b   :  { %930 = vmatprep.subr.bf16.mxu0 %v1665_v54  ;;  %971 = vmatprep.subr.bf16.mxu1 %v1668_v56  ;;  %v1706_v54 = vld [vmem:[#allocation5 + $0x1d0] ss:$12 sps:$4 sm:$0xff]   ;;  %v1708_v56 = vld [vmem:[#allocation5 + $0x278] ss:$12 sps:$4 sm:$0xff]  }
  0x5e   :  { %931 = vmatpush2.bf16.msra.mxu0 %v1663_v57  ;;  %972 = vmatpush2.bf16.msra.mxu1 %v1666_v59  ;;  %v1709_v57 = vld [vmem:[#allocation5 + $0x38] ss:$12 sps:$4 sm:$0xff]   ;;  %v1711_v59 = vld [vmem:[#allocation5 + $0xe0] ss:$12 sps:$4 sm:$0xff]  }
  0x5f   :  { %932 = vmatprep.subr.bf16.mxu0 %v1671_v58  ;;  %973 = vmatprep.subr.bf16.mxu1 %v1674_v60  ;;  %v1710_v58 = vld [vmem:[#allocation5 + $0x1b8] ss:$12 sps:$4 sm:$0xff]   ;;  %v1712_v60 = vld [vmem:[#allocation5 + $0x260] ss:$12 sps:$4 sm:$0xff]  }
  0x62   :  { %933 = vmatpush2.bf16.msra.mxu0 %v1669_v61  ;;  %974 = vmatpush2.bf16.msra.mxu1 %v1672_v62  ;;  %v1713_v61 = vld [vmem:[#allocation5 + $0x20] ss:$12 sps:$4 sm:$0xff]  }
  0x63   :  { %934 = vmatprep.subr.bf16.mxu0 %v1677_v63  ;;  %975 = vmatprep.subr.bf16.mxu1 %v1680_v0  ;;  %v1714_v62 = vld [vmem:[#allocation5 + $0x1a0] ss:$12 sps:$4 sm:$0xff]   ;;  %v1715_v63 = vld [vmem:[#allocation5 + $0xc8] ss:$12 sps:$4 sm:$0xff]  }
  0x64   :  { %v1716_v0 = vld [vmem:[#allocation5 + $0x248] ss:$12 sps:$4 sm:$0xff]  }
  0x66   :  { %935 = vmatpush2.bf16.msra.mxu0 %v1675_v2  ;;  %976 = vmatpush2.bf16.msra.mxu1 %v1678_v3  ;;  %v1717_v2 = vld [vmem:[#allocation5 + $0x8] ss:$12 sps:$4 sm:$0xff]  }
  0x67   :  { %936 = vmatprep.subr.bf16.mxu0 %v1683_v4  ;;  %977 = vmatprep.subr.bf16.mxu1 %v1686_v5  ;;  %v1718_v3 = vld [vmem:[#allocation5 + $0x188] ss:$12 sps:$4 sm:$0xff]   ;;  %v1719_v4 = vld [vmem:[#allocation7 + $0x78] sm:$0xff]  }
  0x68   :  { %v1720_v5 = vld [vmem:[#allocation7 + $0x38] sm:$0xff]  }
  0x6a   :  { %937 = vmatpush2.bf16.msra.mxu0 %v1681_v6  ;;  %978 = vmatpush2.bf16.msra.mxu1 %v1684_v7  ;;  %v1721_v6 = vld [vmem:[#allocation7 + $0x70] sm:$0xff]  }
  0x6b   :  { %1487 = vmatprep.subr.bf16.mxu0 %v1687_v8  ;;  %1509 = vmatprep.subr.bf16.mxu1 %v1688_v9  ;;  %v1722_v7 = vld [vmem:[#allocation7 + $0x30] sm:$0xff]   ;;  %v1723_v8 = vld [vmem:[#allocation7 + $0x68] sm:$0xff]  }
  0x6c   :  { %v1724_v9 = vld [vmem:[#allocation7 + $0x28] sm:$0xff]  }
  0xec   :  { %v165_v21 = vpop.f32.mrf.mxu0  ;;  %v236_v22 = vpop.f32.mrf.mxu1 }
  0xed   :  { %v166_v23 = vadd.f32 %v165_v21, %v78_v17  ;;  %v237_v24 = vadd.f32 %v236_v22, %v86_v18  ;;  %v1728_v17 = vld [vmem:[#allocation7 + $0x18] sm:$0xff]   ;;  %v1729_v18 = vld [vmem:[#allocation7 + $0x50] sm:$0xff]   ;;  %v1732_v21 = vld [vmem:[#allocation7 + $0x8] sm:$0xff]  }
  0xee   :  { %v167_v25 = vpop.f32.mrf.mxu0  ;;  %v238_v26 = vpop.f32.mrf.mxu1  ;;  %v1733_v22 = vld [vmem:[#allocation7 + $0x40] sm:$0xff]  }
  0xef   :  { %v243_v27 = vmax.f32 %v237_v24, 0.0  ;;  %v168_v28 = vadd.f32 %v167_v25, %v82_v19  ;;  %v239_v29 = vadd.f32 %v238_v26, %v90_v20  ;;  %v241_v30 = vmax.f32 %v166_v23, 0.0  ;;  %v1730_v19 = vld [vmem:[#allocation7 + $0x10] sm:$0xff]   ;;  %v1731_v20 = vld [vmem:[#allocation7 + $0x48] sm:$0xff]   ;;  %v1734_v23 = vld [vmem:[#allocation7] sm:$0xff]  }
  0xf0   :  { %v1735_v24 = vld [vmem:[#allocation7 + $0xb8] sm:$0xff]   ;;  %v1736_v25 = vld [vmem:[#allocation7 + $0xb0] sm:$0xff]   ;;  %v1737_v26 = vld [vmem:[#allocation7 + $0xa8] sm:$0xff]  }
  0xf1   :  { %v242_v31 = vmax.f32 %v168_v28, 0.0  ;;  %v244_v32 = vmax.f32 %v239_v29, 0.0  ;;  %v1890_v33 = vpack.c.bf16 %v243_v27, %v243_v27  ;;  %v1892_v38 = vpack.c.bf16 %v241_v30, %v241_v30  ;;  %v1738_v27 = vld [vmem:[#allocation7 + $0xa0] sm:$0xff]   ;;  %v1739_v28 = vld [vmem:[#allocation7 + $0x98] sm:$0xff]   ;;  %v1740_v29 = vld [vmem:[#allocation7 + $0x90] sm:$0xff]  }
  0xf2   :  { %v1741_v30 = vld [vmem:[#allocation7 + $0x88] sm:$0xff]  }
  0xf3   :  { %v246_v34 = vpack.c.bf16 %v242_v31, %v242_v31  ;;  %v248_v35 = vpack.c.bf16 %v244_v32, %v244_v32  ;;  %v1742_v31 = vld [vmem:[#allocation7 + $0x80] sm:$0xff]  }
  0xf4   :  { %v377_v32 = vld [vmem:[%s1923_s4] sm:$0x7] }
  0xf5   :  { %938 = vmatprep.mubr.bf16.mxu0 %v246_v34  ;;  %979 = vmatprep.mubr.bf16.mxu1 %v248_v35 }
  0xf6   :  { %939 = vmatmul.mubr.bf16.vlgmr.msra.gmra.mxu0 %v1892_v38  ;;  %980 = vmatmul.mubr.bf16.vlgmr.msra.gmra.mxu1 %v1890_v33 }
  0xf7   :  { %1488 = vmatpush3.bf16.msra.mxu0 %v1689_v36  ;;  %1510 = vmatpush3.bf16.msra.mxu1 %v1690_v37 }
  0xf8   :  { %1020 = vmatprep.mubr.bf16.mxu0 %v246_v34  ;;  %1060 = vmatprep.mubr.bf16.mxu1 %v248_v35  ;;  %v386_v34 = vrot.slane %v377_v32, %v81_v15 }
  0xf9   :  { %1489 = vmatprep.subr.bf16.mxu0 %v1691_v39  ;;  %1511 = vmatprep.subr.bf16.mxu1 %v1692_v40 }
  0xfb   :  { %1490 = vmatpush3.bf16.msra.mxu0 %v1693_v41  ;;  %1512 = vmatpush3.bf16.msra.mxu1 %v1694_v42 }
  0xfc   :  { %1491 = vmatprep.subr.bf16.mxu0 %v1695_v43  ;;  %1513 = vmatprep.subr.bf16.mxu1 %v1696_v44 }
  0xff   :  { %1492 = vmatpush3.bf16.msra.mxu0 %v1697_v45  ;;  %1514 = vmatpush3.bf16.msra.mxu1 %v1698_v46 }
 0x100   :  { %1493 = vmatprep.subr.bf16.mxu0 %v1699_v47  ;;  %1515 = vmatprep.subr.bf16.mxu1 %v1700_v48 }
 0x103   :  { %1494 = vmatpush3.bf16.msra.mxu0 %v1701_v49  ;;  %1516 = vmatpush3.bf16.msra.mxu1 %v1702_v50  ;;  %v390_v50 = vrot.slane %v377_v32, %v85_v13  ;;  %v1486_v13 = vld [vmem:[#allocation2] ss:$0 sm:$0xff] }
 0x104   :  { %1495 = vmatprep.subr.bf16.mxu0 %v1703_v51  ;;  %1517 = vmatprep.subr.bf16.mxu1 %v1704_v52 }
 0x107   :  { %1496 = vmatpush3.bf16.msra.mxu0 %v1705_v53  ;;  %1518 = vmatpush3.bf16.msra.mxu1 %v1706_v54 }
 0x108   :  { %1497 = vmatprep.subr.bf16.mxu0 %v1707_v55  ;;  %1519 = vmatprep.subr.bf16.mxu1 %v1708_v56 }
 0x10b   :  { %1498 = vmatpush3.bf16.msra.mxu0 %v1709_v57  ;;  %1520 = vmatpush3.bf16.msra.mxu1 %v1710_v58 }
 0x10c   :  { %1499 = vmatprep.subr.bf16.mxu0 %v1711_v59  ;;  %1521 = vmatprep.subr.bf16.mxu1 %v1712_v60 }
 0x10f   :  { %1500 = vmatpush3.bf16.msra.mxu0 %v1713_v61  ;;  %1522 = vmatpush3.bf16.msra.mxu1 %v1714_v62 }
 0x110   :  { %1501 = vmatprep.subr.bf16.mxu0 %v1715_v63  ;;  %1523 = vmatprep.subr.bf16.mxu1 %v1716_v0 }
 0x113   :  { %1502 = vmatpush3.bf16.msra.mxu0 %v1717_v2  ;;  %1524 = vmatpush3.bf16.msra.mxu1 %v1718_v3 }
 0x114   :  { %1531 = vmatprep.subr.bf16.mxu0 %v1719_v4  ;;  %1562 = vmatprep.subr.bf16.mxu1 %v1816_v1 }
 0x116   :  { %1021 = vmatmul.mubr.bf16.vlgmr.msra.gmra.mxu0 %v1892_v38  ;;  %1061 = vmatmul.mubr.bf16.vlgmr.msra.gmra.mxu1 %v1890_v33  ;;  %v382_v33 = vrot.slane %v377_v32, %v77_v12 }
 0x117   :  { %1532 = vmatpush3.bf16.msra.mxu0 %v1720_v5  ;;  %1563 = vmatpush3.bf16.msra.mxu1 %v1735_v24 }
 0x118   :  { %1533 = vmatprep.subr.bf16.mxu0 %v1721_v6  ;;  %1564 = vmatprep.subr.bf16.mxu1 %v1816_v1 }
 0x119   :  { %1578 = vmatprep.mubr.msk.bf16.mxu1 %vm1817_vm1, %v1816_v1 }
 0x11b   :  { %1534 = vmatpush3.bf16.msra.mxu0 %v1722_v7  ;;  %1565 = vmatpush3.bf16.msra.mxu1 %v1736_v25 }
 0x11c   :  { %1535 = vmatprep.subr.bf16.mxu0 %v1723_v8  ;;  %1566 = vmatprep.subr.bf16.mxu1 %v1816_v1 }
 0x11f   :  { %1536 = vmatpush3.bf16.msra.mxu0 %v1724_v9  ;;  %1567 = vmatpush3.bf16.msra.mxu1 %v1737_v26 }
 0x120   :  { %1537 = vmatprep.subr.bf16.mxu0 %v1725_v10  ;;  %1568 = vmatprep.subr.bf16.mxu1 %v1816_v1 }
 0x123   :  { %1538 = vmatpush3.bf16.msra.mxu0 %v1726_v14  ;;  %1569 = vmatpush3.bf16.msra.mxu1 %v1738_v27 }
 0x124   :  { %1539 = vmatprep.subr.bf16.mxu0 %v1727_v16  ;;  %1570 = vmatprep.subr.bf16.mxu1 %v1816_v1 }
 0x127   :  { %1540 = vmatpush3.bf16.msra.mxu0 %v1728_v17  ;;  %1571 = vmatpush3.bf16.msra.mxu1 %v1739_v28 }
 0x128   :  { %1541 = vmatprep.subr.bf16.mxu0 %v1729_v18  ;;  %1572 = vmatprep.subr.bf16.mxu1 %v1816_v1 }
 0x12b   :  { %1542 = vmatpush3.bf16.msra.mxu0 %v1730_v19  ;;  %1573 = vmatpush3.bf16.msra.mxu1 %v1740_v29 }
 0x12c   :  { %1543 = vmatprep.subr.bf16.mxu0 %v1731_v20  ;;  %1574 = vmatprep.subr.bf16.mxu1 %v1816_v1 }
 0x12f   :  { %1544 = vmatpush3.bf16.msra.mxu0 %v1732_v21  ;;  %1575 = vmatpush3.bf16.msra.mxu1 %v1741_v30 }
 0x130   :  { %1545 = vmatprep.subr.bf16.mxu0 %v1733_v22  ;;  %1576 = vmatprep.subr.bf16.mxu1 %v1816_v1 }
 0x133   :  { %1546 = vmatpush3.bf16.msra.mxu0 %v1734_v23  ;;  %1577 = vmatpush3.bf16.msra.mxu1 %v1742_v31 }
 0x1b6   :  { %v940_v35 = vpop.f32.mrf.mxu0  ;;  %v981_v36 = vpop.f32.mrf.mxu1 }
 0x1b7   :  { %v941_v37 = vadd.f32 %v940_v35, %v382_v33 }
 0x1b8   :  { %v942_v38 = vpop.f32.mrf.mxu0  ;;  %v983_v39 = vpop.f32.mrf.mxu1 }
 0x1b9   :  { %v982_v40 = vadd.f32 %v981_v36, %v941_v37  ;;  %v943_v41 = vadd.f32 %v942_v38, %v386_v34 }
 0x1ba   :  { %v944_v42 = vpop.f32.mrf.mxu0  ;;  %v985_v43 = vpop.f32.mrf.mxu1 }
 0x1bb   :  { %v984_v1 = vadd.f32 %v983_v39, %v943_v41  ;;  %v1068_v44 = vmax.f32 %v982_v40, 0.0 }
 0x1bc   :  { %v945_v45 = vpop.f32.mrf.mxu0  ;;  %v986_v46 = vpop.f32.mrf.mxu1 }
 0x1bd   :  { %v1069_v47 = vmax.f32 %v984_v1, 0.0  ;;  %v1071_v49 = vpack.c.bf16 %v1068_v44, %v1068_v44 }
 0x1bf   :  { %v1072_v48 = vpack.c.bf16 %v1069_v47, %v1069_v47 }
 0x1c1   :  { %1298 = vmatprep.mubr.bf16.mxu0 %v1072_v48 }
 0x1c2   :  { %1299 = vmatmul.mubr.bf16.vlgmr.msra.gmra.mxu0 %v1071_v49 }
 0x1d6   :  { %v1503_v12 = vpop.f32.mrf.mxu0  ;;  %v1525_v15 = vpop.f32.mrf.mxu1 }
 0x1d8   :  { %v1504_v51 = vpop.f32.mrf.mxu0  ;;  %v1526_v52 = vpop.f32.mrf.mxu1 }
 0x1d9   :  { %v1505_v53 = vadd.f32 %v1504_v51, %v1503_v12  ;;  %v1527_v57 = vadd.f32 %v1526_v52, %v1525_v15 }
 0x1da   :  { %v1506_v54 = vpop.f32.mrf.mxu0  ;;  %v1528_v55 = vpop.f32.mrf.mxu1 }
 0x1db   :  { %v1023_v56 = vadd.f32 %v1505_v53, %v390_v50 }
 0x1dc   :  { %v1507_v58 = vpop.f32.mrf.mxu0  ;;  %v1529_v59 = vpop.f32.mrf.mxu1 }
 0x1dd   :  { %v1063_v60 = vadd.f32 %v1527_v57, %v1023_v56 }
 0x1df   :  { %v1070_v61 = vmax.f32 %v1063_v60, 0.0 }
 0x1e1   :  { %v1073_v62 = vpack.c.bf16 %v1070_v61, %v1070_v61 }
 0x1e3   :  { %1579 = vmatmul.mubr.bf16.vlgmr.msra.gmra.mxu1 %v1073_v62 }
 0x282   :  { %v1547_v63 = vpop.f32.mrf.mxu0 }
 0x284   :  { %v1548_v0 = vpop.f32.mrf.mxu0 }
 0x285   :  { %v1549_v4 = vadd.f32 %v1548_v0, %v1547_v63 }
 0x286   :  { %v1550_v2 = vpop.f32.mrf.mxu0 }
 0x288   :  { %v1551_v3 = vpop.f32.mrf.mxu0 }
 0x2a3   :  { %v1340_v11 = vpop.f32.mrf.mxu1 }
 0x2a4   :  { %v1341_v5 = vadd.f32 %v1549_v4, %v1340_v11 }
 0x2a5   :  { %v1580_v6 = vpop.f32.mrf.mxu1 }
 0x2a6   :  { %v1353_v7 = vadd.f32 %v1486_v13, %v1341_v5 }
 0x2a7   :  { %v1343_v8 = vpop.f32.mrf.mxu1 }
 0x2a8   :  { %1743 = vtanh.f32 %v1353_v7 }
 0x2a9   :  { %v1581_v9 = vpop.f32.mrf.mxu1 }
 0x2b5   :  { %v1744_v10 = vpop.eup %1743 }
 0x2b6   :  { %v1355_v14 = vmul.f32 2.0, %v1744_v10 }
 0x2b8   :  { %1357 = vst.msk [vmem:[%s1926_s7] sm:$0xff] %vm1356_vm2, %v1355_v14 }
 0x2b9   :  { %1362 = vsyncpa [#allocation4], 1 }
 0x2ba   :  { %1363 = vsyncpa [#allocation6], 1 }

</bundles_post_ra>
